<compile_context>
chip_gen: v7x
topology: tpu7x:2x2x1
jax: 0.10.0
libtpu: 0.0.40
codegen_flags: <defaults>
</compile_context>

<pallas_src>
import functools

import jax
import jax.numpy as jnp
from jax.experimental import pallas as pl
from jax.experimental.pallas import tpu as pltpu

EPS = 1e-5

# sublane alignment for the second-to-last block dim, by element size
_SUBLANE = {4: 8, 2: 16, 1: 32}


def _vmem_capacity_bytes():
    """Physical VMEM of the local chip (fallback: v5e/v6e 128 MiB)."""
    try:
        return int(pltpu.get_tpu_info().vmem_capacity_bytes)
    except Exception:
        return 128 << 20


def _choose_tiles(B, T, D, itemsize, target_bytes):
    """Pick (batch_tile, time_tile) so each x DMA tile is ~target_bytes."""
    sub = _SUBLANE.get(itemsize, 8)
    row_bytes = max(1, D * itemsize)
    rows = max(sub, (target_bytes // row_bytes) // sub * sub)
    if rows < T:
        return 1, int(rows)                     # stream the time axis
    # Whole time axis fits in one tile -> pack batch rows instead.  Partial
    # last batch blocks are fine (Pallas clips OOB rows on writeback); keep
    # >= 2 batch blocks when B >= 2 so the "parallel" axis can shard across
    # v7x's two TensorCores.
    tB = max(1, min(B, int(target_bytes // max(1, T * row_bytes))))
    if B >= 2:
        tB = min(tB, -(-B // 2))
    return int(tB), int(T)


def _stats_pool_kernel(*refs, eps, return_mean, return_std, has_lengths,
                       lengths_in_smem, packed_out, time_tile, n_frames):
    """Statistics pooling over the time axis with streaming accumulators.

    refs (in order): [sizes SMEM (B,) if prefetched], x (tB,tT,D),
                     [sizes VMEM (tB,1,1)], [noise (tB,1,D)],
                     out0 [, out1], sum scratch [, sumsq scratch, shift scratch].
    """
    it = iter(refs)
    sizes_sm = next(it) if (has_lengths and lengths_in_smem) else None
    x_ref = next(it)
    sizes_ref = next(it) if (has_lengths and not lengths_in_smem) else None
    noise_ref = next(it) if return_mean else None
    two_outputs = return_mean and return_std and not packed_out
    out0_ref = next(it)
    out1_ref = next(it) if two_outputs else None
    sum_ref = next(it)
    sumsq_ref = next(it) if return_std else None
    shift_ref = next(it) if return_std else None

    b = pl.program_id(0)
    k = pl.program_id(1)
    n_k = pl.num_programs(1)
    tB, tT, D = x_ref.shape
    f32 = jnp.float32

    # Valid-frame limit: scalar (SMEM-prefetched or static T) or (tB,1,1).
    if has_lengths:
        limit = sizes_sm[b] if lengths_in_smem else sizes_ref[...]
    else:
        limit = n_frames
    scalar_limit = (not has_lengths) or lengths_in_smem

    def masked(v):
        t_idx = jax.lax.broadcasted_iota(jnp.int32, (tB, tT, 1), 1) + k * time_tile
        return jnp.where(t_idx < limit, v, 0.0)

    # ---- first time tile: zero accumulators, derive the variance shift -----
    @pl.when(k == 0)
    def _init():
        sum_ref[...] = jnp.zeros_like(sum_ref)
        if return_std:
            sumsq_ref[...] = jnp.zeros_like(sumsq_ref)
            # Provisional mean from tile 0: accumulating (x - shift) keeps
            # var = (q - s^2/n)/(n-1) free of catastrophic cancellation and is
            # exactly two-pass when a single tile covers the whole time axis.
            x0 = x_ref[...].astype(f32)
            if has_lengths:
                x0 = masked(x0)
                n0 = jnp.maximum(jnp.clip(limit, 0, time_tile), 1).astype(f32)
            else:
                n0 = f32(min(n_frames, time_tile))
            shift_ref[...] = jnp.sum(x0, axis=1, keepdims=True) / n0

    # ---- streamed accumulation ---------------------------------------------
    def accumulate(apply_mask):
        v = x_ref[...].astype(f32)
        if return_std:
            v = v - shift_ref[...]
        if apply_mask:
            v = masked(v)                       # mask AFTER the shift
        sum_ref[...] += jnp.sum(v, axis=1, keepdims=True)
        if return_std:
            sumsq_ref[...] += jnp.sum(v * v, axis=1, keepdims=True)

    if scalar_limit:
        if (not has_lengths) and (n_frames % time_tile == 0):
            accumulate(False)                   # every tile fully valid
        else:
            start = k * time_tile
            end = start + time_tile

            @pl.when(end <= limit)              # fully valid: no mask at all
            def _full():
                accumulate(False)

            @pl.when(jnp.logical_and(start < limit, end > limit))
            def _partial():                     # straddles the limit: mask
                accumulate(True)
            # start >= limit: skipped entirely (its DMA was also elided by the
            # clamped index_map when lengths are scalar-prefetched).
    else:
        accumulate(True)                        # per-row vector limit (nT==1)

    # ---- last time tile: finalize -------------------------------------------
    @pl.when(k == n_k - 1)
    def _finalize():
        if has_lengths:
            n_f = limit.astype(f32)             # scalar or (tB,1,1)
        else:
            n_f = f32(n_frames)
        # NOTE: mirrors the PyTorch module -- actual_size==0 (mean) or ==1
        # (unbiased std) yields inf/nan just like torch.mean / torch.std.
        s = sum_ref[...]
        mean = s / n_f
        if return_std:
            mean = shift_ref[...] + mean
            var = (sumsq_ref[...] - s * s / n_f) / (n_f - 1.0)
            std = jnp.sqrt(jnp.maximum(var, 0.0)) + eps
        out_dtype = out0_ref.dtype
        if return_mean:
            mean_out = (mean + noise_ref[...].astype(f32)).astype(out_dtype)
        if return_std:
            std_out = std.astype(out_dtype)
        if return_mean and return_std:
            if packed_out:                      # lane-aligned direct slices
                out0_ref[:, :, :D] = mean_out
                out0_ref[:, :, D:] = std_out
            else:
                out0_ref[...] = mean_out
                out1_ref[...] = std_out
        elif return_mean:
            out0_ref[...] = mean_out
        else:
            out0_ref[...] = std_out


def _gauss_noise(key, shape, eps):
    """Reproduces StatisticsPooling._get_gauss_noise (global min/max norm)."""
    g = jax.random.normal(key, shape, dtype=jnp.float32)
    g = g - jnp.min(g)
    g = g / jnp.max(g)
    return eps * ((1 - 9) * g + 9)


def statistics_pooling(x, lengths=None, *, return_mean=True, return_std=False,
                       key=None, eps=EPS, target_tile_bytes=8 * 1024 * 1024):
    """Pallas implementation of StatisticsPooling.forward.

    x       : (B, T, D) float array
    lengths : optional (B,) relative lengths in [0, 1]
    returns : (B, 1, D) if only mean or only std, (B, 1, 2D) if both.
    """
    if not (return_mean or return_std):
        raise ValueError("both of statistics are equal to False")
    B, T, D = x.shape
    has_lengths = lengths is not None
    itemsize = x.dtype.itemsize

    vmem_cap = _vmem_capacity_bytes()
    # Keep x's double/triple buffers comfortably inside the smaller v7x VMEM.
    eff_target = min(int(target_tile_bytes), max(256 * 1024, vmem_cap // 6))
    tB, tT = _choose_tiles(B, T, D, itemsize, eff_target)
    nB, nT = pl.cdiv(B, tB), pl.cdiv(T, tT)
    lengths_in_smem = has_lengths and tB == 1   # streamed time axis

    both = return_mean and return_std
    packed_out = both and (D % 128 == 0)        # lane-aligned in-kernel pack

    x_tile_bytes = tB * tT * D * itemsize
    use_triple = x_tile_bytes < (2 << 20) and nT >= 3

    # ---- index maps ---------------------------------------------------------
    if lengths_in_smem:
        def x_map(bi, ki, sz):
            # Time tiles entirely past this row's valid frames re-use the
            # previous block index, so their HBM DMA is elided.
            last = jnp.maximum((sz[bi] + tT - 1) // tT - 1, 0)
            return (bi, jnp.minimum(ki, last), 0)

        def row_map(bi, ki, sz):
            return (bi, 0, 0)
    else:
        def x_map(bi, ki):
            return (bi, ki, 0)

        def row_map(bi, ki):
            return (bi, 0, 0)

    # ---- inputs -------------------------------------------------------------
    inputs = []
    num_prefetch = 0
    in_specs = []

    sizes = None
    if has_lengths:
        sizes = jnp.round(lengths.astype(jnp.float32) * T).astype(jnp.int32)
    if lengths_in_smem:
        inputs.append(sizes)                    # scalar-prefetched into SMEM
        num_prefetch = 1

    if use_triple:
        try:
            x_spec = pl.BlockSpec((tB, tT, D), x_map, pipeline_mode=pl.Buffered(3))
        except TypeError:                        # BlockSpec w/o pipeline_mode
            x_spec = pl.BlockSpec((tB, tT, D), x_map)
            use_triple = False
    else:
        x_spec = pl.BlockSpec((tB, tT, D), x_map)
    inputs.append(x)
    in_specs.append(x_spec)

    if has_lengths and not lengths_in_smem:      # per-row vector limit path
        inputs.append(sizes.reshape(B, 1, 1))
        in_specs.append(pl.BlockSpec((tB, 1, 1), row_map))

    if return_mean:
        if key is None:
            key = jax.random.PRNGKey(0)
        noise = _gauss_noise(key, (B, D), eps).reshape(B, 1, D)
        inputs.append(noise)
        in_specs.append(pl.BlockSpec((tB, 1, D), row_map))

    # ---- outputs ------------------------------------------------------------
    if both and packed_out:
        out_shape = jax.ShapeDtypeStruct((B, 1, 2 * D), x.dtype)
        out_specs = pl.BlockSpec((tB, 1, 2 * D), row_map)
    elif both:
        out_shape = (jax.ShapeDtypeStruct((B, 1, D), x.dtype),
                     jax.ShapeDtypeStruct((B, 1, D), x.dtype))
        out_specs = (pl.BlockSpec((tB, 1, D), row_map),
                     pl.BlockSpec((tB, 1, D), row_map))
    else:
        out_shape = jax.ShapeDtypeStruct((B, 1, D), x.dtype)
        out_specs = pl.BlockSpec((tB, 1, D), row_map)

    # ---- scratch accumulators (persist across the time-tile axis) ----------
    scratch = [pltpu.VMEM((tB, 1, D), jnp.float32)]           # running sum
    if return_std:
        scratch += [pltpu.VMEM((tB, 1, D), jnp.float32),      # running sumsq
                    pltpu.VMEM((tB, 1, D), jnp.float32)]      # variance shift

    kernel = functools.partial(
        _stats_pool_kernel, eps=eps, return_mean=return_mean,
        return_std=return_std, has_lengths=has_lengths,
        lengths_in_smem=lengths_in_smem, packed_out=packed_out,
        time_tile=tT, n_frames=T)

    # Generation-aware VMEM budget: need-driven, capped at ~75% of physical
    # VMEM (~48 MiB on v7x, ~96 MiB on v5e/v6e).
    bufs = 3 if use_triple else 2
    need = (bufs * x_tile_bytes + 6 * tB * D * max(itemsize, 4)
            + len(scratch) * tB * D * 4)
    vmem_bytes = int(max(16 << 20, min(vmem_cap * 3 // 4, need + (8 << 20))))

    n_out = (2 * B * D) if both else (B * D)
    cost = pl.CostEstimate(
        flops=(3 if both else 2) * B * T * D,
        transcendentals=0,
        bytes_accessed=x.size * itemsize + n_out * itemsize
                       + (B * D * 4 if return_mean else 0))

    out = pl.pallas_call(
        kernel,
        out_shape=out_shape,
        grid_spec=pltpu.PrefetchScalarGridSpec(
            num_scalar_prefetch=num_prefetch,
            grid=(nB, nT),
            in_specs=in_specs,
            out_specs=out_specs,
            scratch_shapes=scratch),
        compiler_params=pltpu.CompilerParams(
            dimension_semantics=("parallel", "arbitrary"),
            vmem_limit_bytes=vmem_bytes),
        cost_estimate=cost,
    )(*inputs)

    if both and not packed_out:
        mean_out, std_out = out
        return jnp.concatenate([mean_out, std_out], axis=-1)   # (B, 1, 2D)
    return out


def _reference(x, lengths, return_mean, return_std, noise, eps=EPS):
    """Pure-jnp reference mirroring the PyTorch forward (same noise array)."""
    B, T, D = x.shape
    if lengths is None:
        sizes = jnp.full((B,), T, dtype=jnp.int32)
    else:
        sizes = jnp.round(lengths * T).astype(jnp.int32)
    t_idx = jnp.arange(T)[None, :, None]
    mask = (t_idx < sizes[:, None, None]).astype(jnp.float32)
    n = sizes.astype(jnp.float32)[:, None]
    mean = jnp.sum(x * mask, axis=1) / n
    outs = []
    if return_mean:
        outs.append(mean + noise)
    if return_std:
        var = jnp.sum(((x - mean[:, None, :]) * mask) ** 2, axis=1) / (n - 1.0)
        outs.append(jnp.sqrt(var) + eps)
    return jnp.concatenate(outs, axis=1)[:, None, :]


if __name__ == "__main__":
    root = jax.random.PRNGKey(0)
    k_x, k_x2, k_x3, k_noise = jax.random.split(root, 4)

    # 1) module defaults: mean only, no lengths
    B, T, D = 2, 8, 32
    x = jax.random.normal(k_x, (B, T, D), dtype=jnp.float32)
    noise = _gauss_noise(k_noise, (B, D), EPS)
    out1 = jax.block_until_ready(statistics_pooling(x, key=k_noise))
    assert out1.shape == (B, 1, D)
    assert jnp.allclose(out1, _reference(x, None, True, False, noise),
                        atol=1e-5, rtol=1e-4)

    # 2) mean + std with lengths; single time tile, scalar-prefetched sizes
    lengths = jnp.array([1.0, 0.5], dtype=jnp.float32)
    out2 = jax.block_until_ready(
        statistics_pooling(x, lengths, return_mean=True, return_std=True, key=k_noise))
    assert out2.shape == (B, 1, 2 * D)
    assert jnp.allclose(out2, _reference(x, lengths, True, True, noise),
                        atol=1e-5, rtol=1e-4)

    # 3) streamed time axis (nT=3) with lengths: padded-tile DMA skip + mask
    #    gating + shifted variance + Buffered(3) path
    B3, T3, D3 = 2, 20, 32
    x3 = jax.random.normal(k_x2, (B3, T3, D3), dtype=jnp.float32)
    lengths3 = jnp.array([0.85, 0.4], dtype=jnp.float32)      # sizes 17, 8
    out3 = jax.block_until_ready(
        statistics_pooling(x3, lengths3, return_mean=True, return_std=True,
                           key=k_noise, target_tile_bytes=1024))
    noise3 = _gauss_noise(k_noise, (B3, D3), EPS)
    assert out3.shape == (B3, 1, 2 * D3)
    assert jnp.allclose(out3, _reference(x3, lengths3, True, True, noise3),
                        atol=1e-5, rtol=1e-4)

    # 4) std only with lengths (no noise input, no mean output)
    out4 = jax.block_until_ready(
        statistics_pooling(x, lengths, return_mean=False, return_std=True))
    assert out4.shape == (B, 1, D)
    assert jnp.allclose(out4, _reference(x, lengths, False, True, None),
                        atol=1e-5, rtol=1e-4)

    # 5) lane-aligned D: packed (B,1,2D) output written via direct slices
    B5, T5, D5 = 2, 8, 128
    x5 = jax.random.normal(k_x3, (B5, T5, D5), dtype=jnp.float32)
    noise5 = _gauss_noise(k_noise, (B5, D5), EPS)
    out5 = jax.block_until_ready(
        statistics_pooling(x5, None, return_mean=True, return_std=True, key=k_noise))
    assert out5.shape == (B5, 1, 2 * D5)
    assert jnp.allclose(out5, _reference(x5, None, True, True, noise5),
                        atol=1e-5, rtol=1e-4)

    # 6) batch-packed blocks (tB=3, nB=2, partial last batch block) + per-row mask
    B6 = 5
    x6 = jax.random.normal(k_x2, (B6, T, D), dtype=jnp.float32)
    lengths6 = jnp.array([1.0, 0.75, 0.5, 0.25, 1.0], dtype=jnp.float32)
    noise6 = _gauss_noise(k_noise, (B6, D), EPS)
    out6 = jax.block_until_ready(
        statistics_pooling(x6, lengths6, return_mean=True, return_std=True, key=k_noise))
    assert out6.shape == (B6, 1, 2 * D)
    assert jnp.allclose(out6, _reference(x6, lengths6, True, True, noise6),
                        atol=1e-5, rtol=1e-4)

    # 7) streamed time axis without lengths (partial last tile masked statically)
    out7 = jax.block_until_ready(
        statistics_pooling(x3, None, return_mean=True, return_std=True,
                           key=k_noise, target_tile_bytes=1024))
    assert out7.shape == (B3, 1, 2 * D3)
    assert jnp.allclose(out7, _reference(x3, None, True, True, noise3),
                        atol=1e-5, rtol=1e-4)

    print("KERNEL_OK")
</pallas_src>

<mosaic_0001>
module attributes {stable_mosaic.version = 11 : i64} {
  func.func @_stats_pool_kernel(%arg0: i32, %arg1: i32, %arg2: memref<1x8x32xf32, #tpu.memory_space<vmem>>, %arg3: memref<1x1x32xf32, #tpu.memory_space<vmem>>, %arg4: memref<1x1x32xf32, #tpu.memory_space<vmem>>, %arg5: memref<1x1x32xf32, #tpu.memory_space<vmem>>) attributes {dimension_semantics = [#tpu.dimension_semantics<parallel>, #tpu.dimension_semantics<arbitrary>], iteration_bounds = array<i64: 2, 1>, scalar_prefetch = 0 : i64, scratch_operands = 1 : i64, tpu.core_type = #tpu.core_type<tc>, window_params = [{transform_indices = @transform_0, window_bounds = array<i64: 1, 8, 32>}, {transform_indices = @transform_1, window_bounds = array<i64: 1, 1, 32>}, {transform_indices = @transform_2, window_bounds = array<i64: 1, 1, 32>}]} {
    %c0_i32 = arith.constant 0 : i32
    %0 = arith.cmpi eq, %arg1, %c0_i32 : i32
    %1 = arith.extui %0 : i1 to i32
    %c0_i32_0 = arith.constant 0 : i32
    %2 = arith.cmpi ne, %1, %c0_i32_0 : i32
    scf.if %2 {
      %cst_11 = arith.constant 0.000000e+00 : f32
      %12 = vector.broadcast %cst_11 : f32 to vector<1x1x32xf32>
      %c0_12 = arith.constant 0 : index
      %c0_13 = arith.constant 0 : index
      %c0_14 = arith.constant 0 : index
      %13 = vector.load %arg5[%c0_12, %c0_13, %c0_14] : memref<1x1x32xf32, #tpu.memory_space<vmem>>, vector<1x1x32xf32>
      tpu.vector_store %arg5[%c0_12, %c0_13, %c0_14], %12 {strides = array<i32>} : memref<1x1x32xf32, #tpu.memory_space<vmem>>, vector<1x1x32xf32>,
    } else {
    }
    %c0 = arith.constant 0 : index
    %c0_1 = arith.constant 0 : index
    %c0_2 = arith.constant 0 : index
    %3 = vector.load %arg2[%c0, %c0_1, %c0_2] : memref<1x8x32xf32, #tpu.memory_space<vmem>>, vector<1x8x32xf32>
    %c0_3 = arith.constant 0 : index
    %c0_4 = arith.constant 0 : index
    %c0_5 = arith.constant 0 : index
    %4 = vector.load %arg5[%c0_3, %c0_4, %c0_5] : memref<1x1x32xf32, #tpu.memory_space<vmem>>, vector<1x1x32xf32>
    %cst = arith.constant dense<0.000000e+00> : vector<1x32xf32>
    %5 = vector.multi_reduction <add>, %3, %cst [1] : vector<1x8x32xf32> to vector<1x32xf32>
    %6 = vector.shape_cast %5 : vector<1x32xf32> to vector<1x1x32xf32>
    %7 = arith.addf %4, %6 : vector<1x1x32xf32>
    %c0_6 = arith.constant 0 : index
    %c0_7 = arith.constant 0 : index
    %c0_8 = arith.constant 0 : index
    %8 = vector.load %arg5[%c0_6, %c0_7, %c0_8] : memref<1x1x32xf32, #tpu.memory_space<vmem>>, vector<1x1x32xf32>
    tpu.vector_store %arg5[%c0_6, %c0_7, %c0_8], %7 {strides = array<i32>} : memref<1x1x32xf32, #tpu.memory_space<vmem>>, vector<1x1x32xf32>,
    %c0_i32_9 = arith.constant 0 : i32
    %9 = arith.cmpi eq, %arg1, %c0_i32_9 : i32
    %10 = arith.extui %9 : i1 to i32
    %c0_i32_10 = arith.constant 0 : i32
    %11 = arith.cmpi ne, %10, %c0_i32_10 : i32
    scf.if %11 {
      %c0_11 = arith.constant 0 : index
      %c0_12 = arith.constant 0 : index
      %c0_13 = arith.constant 0 : index
      %12 = vector.load %arg5[%c0_11, %c0_12, %c0_13] : memref<1x1x32xf32, #tpu.memory_space<vmem>>, vector<1x1x32xf32>
      %cst_14 = arith.constant 8.000000e+00 : f32
      %13 = vector.broadcast %cst_14 : f32 to vector<1x1x32xf32>
      %14 = arith.divf %12, %13 : vector<1x1x32xf32>
      %c0_15 = arith.constant 0 : index
      %c0_16 = arith.constant 0 : index
      %c0_17 = arith.constant 0 : index
      %15 = vector.load %arg3[%c0_15, %c0_16, %c0_17] : memref<1x1x32xf32, #tpu.memory_space<vmem>>, vector<1x1x32xf32>
      %16 = arith.addf %14, %15 : vector<1x1x32xf32>
      %c0_18 = arith.constant 0 : index
      %c0_19 = arith.constant 0 : index
      %c0_20 = arith.constant 0 : index
      %17 = vector.load %arg4[%c0_18, %c0_19, %c0_20] : memref<1x1x32xf32, #tpu.memory_space<vmem>>, vector<1x1x32xf32>
      tpu.vector_store %arg4[%c0_18, %c0_19, %c0_20], %16 {strides = array<i32>} : memref<1x1x32xf32, #tpu.memory_space<vmem>>, vector<1x1x32xf32>,
    } else {
    }
    return
  }
  func.func @transform_0(%arg0: i32, %arg1: i32) -> (i32, i32, i32) {
    %c0_i32 = arith.constant 0 : i32
    %c0_i32_0 = arith.constant 0 : i32
    return %arg0, %arg1, %c0_i32 : i32, i32, i32
  }
  func.func @transform_1(%arg0: i32, %arg1: i32) -> (i32, i32, i32) {
    %c0_i32 = arith.constant 0 : i32
    %c0_i32_0 = arith.constant 0 : i32
    %c0_i32_1 = arith.constant 0 : i32
    return %arg0, %c0_i32, %c0_i32_0 : i32, i32, i32
  }
  func.func @transform_2(%arg0: i32, %arg1: i32) -> (i32, i32, i32) {
    %c0_i32 = arith.constant 0 : i32
    %c0_i32_0 = arith.constant 0 : i32
    %c0_i32_1 = arith.constant 0 : i32
    return %arg0, %c0_i32, %c0_i32_0 : i32, i32, i32
  }
}

</mosaic_0001>

<bundles_post_ra>
// kernel: tpu_custom_call.1
= control target key start
LH: loop header
LB: loop body
LE: loop exit
PB: predicated region body
PF: predicated region fallthrough
CT: control target
= control target key end

     0   :  { %7 = vsyncpa [#allocation4], 0  ;;  %s699_s0 = inlined_call_operand.hbm [shape: f32[2,8,32], index: 0, kind: input, shape index: {}]   ;;  %s700_s1 = inlined_call_operand.vmem [shape: f32[2,1,32], index: 1, kind: input, shape index: {}]   ;;  %s701_s2 = inlined_call_operand.hbm [shape: f32[2,1,32], index: 2, kind: output, shape index: {}]  }
   0x1   :  { %9 = vsyncpa [#allocation4 + $0x1], 0 }
   0x2   :  { %10 = vsyncpa [#allocation5], 0 }
   0x3   :  { %12 = vsyncpa [#allocation5 + $0x1], 0  ;;  %s518_s9 = smov 0   ;;  %s520_s10 = smov 0  }
   0x4   :  { %s522_s11 = smov 0   ;;  %s524_s12 = smov 0  }
   0x5   :  { %s526_s13 = smov 0   ;;  %s528_s14 = smov 0  }
   0x6 LB: > { %s312_s15 = sadd.s32 4294967295, %s498_s14   ;;  %s313_s16 = sadd.s32 4294967294, %s498_s14   ;;  %s498_s14 = sphi %s528_s14, %s18_s14   ;;  %s494_s13 = sphi %s526_s13, %s717_s13   ;;  %s490_s12 = sphi %s524_s12, %s716_s12   ;;  %s486_s11 = sphi %s522_s11, %s715_s11   ;;  %s482_s10 = sphi %s520_s10, %s714_s10   ;;  %s478_s9 = sphi %s518_s9, %s713_s9  }
   0x7   : > { %s30_s17 = sadd.s32 1, %s494_s13  ;;  %s39_s18 = sadd.s32 1, %s486_s11 }
   0x8   : > { %p32_p0 = scmp.ge.s32.totalorder %s30_s17, 2  ;;  %p46_p1 = scmp.ne.s32.totalorder %s486_s11, %s482_s10 }
   0x9   : > { %p47_p2 = scmp.eq.s32.totalorder %s498_s14, 0  ;;  %p52_p3 = scmp.ne.s32.totalorder %s482_s10, %s478_s9 }
   0xa   : > { %s719_s17 = smov (%p32_p0, %s30_s17), 0  ;;  %p53_p5 = scmp.eq.s32.totalorder %s312_s15, 0 }
   0xb   : > { %p559_p4 = por %p47_p2, %p46_p1  ;;  %s34_s20 = ssub.s32 %s494_s13, %s719_s17 }
   0xc   : > { %p102_p6 = scmp.eq.s32.totalorder %s312_s15, 1  ;;  %p37_p7 = scmp.eq.s32.totalorder %s34_s20, 0 }
   0xd   : > { %p565_p8 = por %p53_p5, %p52_p3  ;;  %p108_p10 = scmp.eq.s32.totalorder %s313_s16, 1 }
   0xe   : > { %p569_p9 = por %p102_p6, %p46_p1  ;;  %p335_p13 = scmp.lt.s32.totalorder %s498_s14, 2 }
   0xf   : > { %s574_s23 = scalar_select %p37_p7, %s486_s11, %s39_s18  }
  0x10   : > { %s705_s22 = scalar_select %p569_p9, 1, 0 }
  0x11   : > { %p576_p11 = por %p108_p10, %p52_p3  ;;  %s128_s25 = sand.u32 1, %s486_s11  }
  0x12   : > { %s316_s26 = sshll.u32 %s128_s25, 3  ;;  %s317_s27 = sshll.u32 %s494_s13, 7 }
  0x13   : > { %s706_s24 = scalar_select %p576_p11, 1, 0 }
  0x14   : > { %s587_s30 = scalar_lea.hbm %s699_s0, %s317_s27  ;;  %s132_s3 = scalar_lea.vmem [#allocation3], %s316_s26 }
  0x15   : > { %s140_s4 = sshll.u32 %s132_s3, 4  ;;  %p593_p0 = pnand %p335_p13, %p559_p4  ;;  %s589_s4 = int_to_ptr.vmem [resolvable:$true] %s140_s4 }
  0x16   : > { %s129_s6 = scalar_lea.sflag [#allocation4], %s128_s25  ;;  %s386_s7 = scalar_lea.hbm %s587_s30, 128 }
  0x17   : > { %p387_p3 = scmp.ne.s32.totalorder %s587_s30, %s386_s7  ;;  %p388_p5 = pneg %p593_p0 }
  0x18   : > { %s391_s16 = scalar_lea.hbm %s699_s0, 256  ;;  %p392_p4 = scmp.lt.u32.totalorder %s587_s30, %s699_s0 }
  0x19   : > { %p389_p6 = pnand %p388_p5, %p387_p3  ;;  %p393_p10 = scmp.lt.u32.totalorder %s391_s16, %s386_s7 }
  0x1a   : > { %p395_p12 = scmp.lt.u32.totalorder %s386_s7, %s587_s30 }
  0x1b   : > { %p390_p7 = pneg %p389_p6  ;;  %p394_p13 = por %p393_p10, %p392_p4 }
  0x1d   : > { %p396_p1 = por %p395_p12, %p394_p13 }
  0x1f   : > { %p397_p2 = pnand %p396_p1, %p390_p7 }
  0x21   : > { %400 = shalt.err (!%p397_p2)
}
  0x22   : > { %s401_s20 = scalar_lea.vmem %s589_s4, 128  ;;  %s500_s25 = smov [#allocation3]  }
  0x23   : > { %p402_p3 = scmp.ne.s32.totalorder %s589_s4, %s401_s20  ;;  %s406_s26 = sshll.u32 %s500_s25, 4  ;;  %s407_s26 = int_to_ptr.vmem [resolvable:$false] %s406_s26 }
  0x24   : > { %s408_s27 = scalar_lea.vmem %s407_s26, 256  ;;  %p409_p9 = scmp.lt.s32.totalorder %s589_s4, %s407_s26 }
  0x25   : > { %p404_p6 = pnand %p402_p3, %p388_p5  ;;  %p410_p4 = scmp.lt.s32.totalorder %s408_s27, %s401_s20 }
  0x27   : > { %p405_p11 = pneg %p404_p6  ;;  %p411_p10 = por %p410_p4, %p409_p9 }
  0x29   : > { %p412_p12 = pnand %p411_p10, %p405_p11 }
  0x2b   : > { %415 = shalt.err (!%p412_p12)
}
  0x2c   : > { %330 = dma.hbm_to_vmem [thread:$0]  (!%p593_p0), %s587_s30, 128, %s589_s4, %s129_s6  }
  0x2d   : > { %p708_p1 = scmp.lt.s32.totalorder %s498_s14, 3  ;;  %p709_p2 = scmp.ge.s32.totalorder %s498_s14, 1 }
  0x2f   : > { %p152_p5 = pnand %p709_p2, %p708_p1 }
  0x30   : > { %s629_s28 = sand.u32 (!%p152_p5), 1, %s482_s10  }
  0x31   : > { %155 = sbr.rel (%p152_p5) target bundleno = 99 (0x63), region = 28  ;;  %s319_s29 = sshll.u32 (!%p152_p5), %s629_s28, 3 }
  0x32   : > { %s158_s3 = scalar_lea.sflag (!%p152_p5), [#allocation4], %s629_s28  ;;  %s161_s7 = scalar_lea.vmem (!%p152_p5), [#allocation3], %s319_s29 }
  0x38   : > { %469 = dma.done.wait (%p565_p8), %s158_s3, 128  }
  0x39   : > { %471 = vsyncadd (%p565_p8), %s158_s3, 4294967168  ;;  %vm191_vm0 = vcmask 253952   ;;  %v501_v0 = vmov 0.0   ;;  %vm195_vm1 = vcmask 261120   ;;  %v193_v1 = vld [vmem:[%s161_s7] sm:$0xff]  ;;  %p184_p8 = scmp.lt.s32.totalorder %s490_s12, 1 }
  0x3a   : > { %192 = vst.msk [vmem:[#allocation2] sm:$0x1] %vm191_vm0, %v501_v0  ;;  %v196_v2 = vsel %vm195_vm1, %v193_v1, 0.0  ;;  %s183_s6 = scalar_lea.vmem [#allocation6], %s629_s28  ;;  %s320_s15 = sshll.u32 %s490_s12, 4 }
  0x3b   : > { %v197_v3 = vrot.slane %v196_v2, 4  ;;  %s185_s21 = scalar_select %p184_p8, %s490_s12, 1 }
  0x3c   : > { %s228_s8 = sshll.u32 %s183_s6, 4  ;;  %s651_s19 = scalar_lea.hbm %s701_s2, %s320_s15  ;;  %s646_s8 = int_to_ptr.vmem [resolvable:$true] %s228_s8 }
  0x3d   : > { %v198_v4 = vadd.f32 %v197_v3, %v196_v2  ;;  %s186_s5 = scalar_lea.vmem %s700_s1, %s185_s21  ;;  %s216_s20 = scalar_lea.sflag [#allocation5], %s629_s28 }
  0x3e   : > { %v212_v12 = vld [vmem:[%s186_s5] sm:$0x1]  ;;  %s416_s25 = scalar_lea.vmem %s646_s8, 16  ;;  %p710_p11 = scmp.ne.s32.totalorder %s705_s22, 0 }
  0x3f   : > { %v199_v5 = vrot.slane %v198_v4, 2  ;;  %p417_p9 = scmp.ne.s32.totalorder %s646_s8, %s416_s25  ;;  %s502_s12 = smov [#allocation6]  }
  0x40   : > { %s420_s26 = sshll.u32 %s502_s12, 4  ;;  %s421_s26 = int_to_ptr.vmem [resolvable:$false] %s420_s26 }
  0x41   : > { %v200_v6 = vadd.f32 %v199_v5, %v198_v4  ;;  %v194_v8 = vld [vmem:[#allocation2] sm:$0x1]  ;;  %p418_p0 = pnand %p417_p9, %p710_p11  ;;  %s422_s27 = scalar_lea.vmem %s421_s26, 32 }
  0x42   : > { %p423_p13 = scmp.lt.s32.totalorder %s646_s8, %s421_s26  ;;  %p424_p3 = scmp.lt.s32.totalorder %s422_s27, %s416_s25 }
  0x43   : > { %v201_v7 = vrot.slane %v200_v6, 1  ;;  %p419_p7 = pneg %p418_p0 }
  0x44   : > { %p425_p6 = por %p424_p3, %p423_p13 }
  0x45   : > { %v202_v9 = vadd.f32 %v201_v7, %v200_v6 }
  0x46   : > { %p426_p4 = pnand %p425_p6, %p419_p7 }
  0x47   : > { %v203_v10 = vadd.f32 %v202_v9, %v194_v8 }
  0x49   : > { %205 = vst.msk [vmem:[#allocation2] sm:$0x1] %vm191_vm0, %v203_v10 }
  0x50   : > { %v209_v11 = vld [vmem:[#allocation2] sm:$0x1] }
  0x51   : > { %v211_v13 = vmul.f32 0.125, %v209_v11 }
  0x53   : > { %v213_v14 = vadd.f32 %v212_v12, %v211_v13 }
  0x55   : > { %214 = vst.msk [vmem:[%s183_s6] sm:$0x1] %vm191_vm0, %v213_v14 }
  0x56   : > { %429 = shalt.err (!%p426_p4)
}
  0x57   : > { %s430_s28 = scalar_lea.hbm %s651_s19, 16  ;;  %s434_s7 = scalar_lea.hbm %s701_s2, 32 }
  0x58   : > { %p431_p10 = scmp.ne.s32.totalorder %s651_s19, %s430_s28  ;;  %p435_p2 = scmp.lt.u32.totalorder %s651_s19, %s701_s2 }
  0x59   : > { %p436_p5 = scmp.lt.u32.totalorder %s434_s7, %s430_s28  ;;  %p438_p9 = scmp.lt.u32.totalorder %s430_s28, %s651_s19 }
  0x5a   : > { %p432_p12 = pnand %p431_p10, %p710_p11 }
  0x5b   : > { %p437_p8 = por %p436_p5, %p435_p2 }
  0x5c   : > { %p433_p1 = pneg %p432_p12 }
  0x5d   : > { %p439_p0 = por %p438_p9, %p437_p8 }
  0x5f   : > { %p440_p7 = pnand %p439_p0, %p433_p1 }
  0x61   : > { %443 = shalt.err (!%p440_p7)
}
  0x62   : > { %325 = dma.vmem_to_hbm [thread:$0]  (%p710_p11), %s646_s8, 16, %s651_s19, %s216_s20  }
  0x63 PF: > { %s240_s4 = sand.u32 1, %s478_s9   ;;  %p711_p13 = scmp.ne.s32.totalorder %s706_s24, 0 }
  0x64   : > { %p712_p3 = scmp.ge.s32.totalorder %s498_s14, 2  ;;  %s241_s5 = scalar_lea.sflag [#allocation5], %s240_s4 }
  0x66   : > { %p332_p6 = pnand %p712_p3, %p711_p13 }
  0x68   : > { %473 = dma.done.wait (!%p332_p6), %s241_s5, 16  }
  0x69   : > { %475 = vsyncadd (!%p332_p6), %s241_s5, 4294967280  ;;  %s18_s14 = sadd.s32 1, %s498_s14   ;;  %s713_s9 = smov %s482_s10 }
  0x6a   : > { %p15_p4 = scmp.ge.s32.totalorder %s18_s14, 4   ;;  %s714_s10 = smov %s486_s11 }
  0x6b   : > { %s715_s11 = smov %s574_s23  ;;  %s716_s12 = smov %s494_s13 }
  0x6c   : > { %s717_s13 = smov %s719_s17  ;;  %17 = sbr.rel (!%p15_p4) target bundleno = 6 (0x6), region = 84 }
  0x73   :  { %245 = vsyncpa [#allocation4], 1 }
  0x74   :  { %247 = vsyncpa [#allocation4 + $0x1], 1 }
  0x75   :  { %248 = vsyncpa [#allocation5], 1 }
  0x76   :  { %250 = vsyncpa [#allocation5 + $0x1], 1 }

</bundles_post_ra>
